<compile_context>
chip_gen: v6e
topology: v6e:2x2x1
jax: 0.10.0
libtpu: 0.0.40
codegen_flags: <defaults>
</compile_context>

<pallas_src>
import jax
import jax.numpy as jnp
from jax import lax
from jax.experimental import pallas as pl
from jax.experimental.pallas import tpu as pltpu

EPS = 1e-5
NEG_SLOPE = 0.01                       # nn.LeakyReLU() default
VMEM_LIMIT = 32 * 1024 * 1024          # explicit scoped-VMEM limit (v5e default is 16 MiB)


def _leaky(x):
    return jnp.where(x > 0, x, NEG_SLOPE * x)


def _pick_rows(n, max_rows):
    """Largest sublane-aligned (multiple of 8) divisor of n that is <= max_rows.

    Falls back to the full extent, which is always a legal block shape."""
    if n <= max_rows:
        return n
    for d in range(max_rows - max_rows % 8, 0, -8):
        if n % d == 0:
            return d
    return n


# ---------------------------------------------------------------------------
# Pass 1: y = conv1x1(x); per-tile partial per-channel sum / sum-of-squares.
# ---------------------------------------------------------------------------
def _stats_mid_kernel(x_ref, w1f_ref, smid_ref, stats_ref):
    # x_ref:     (TR, W*Cin)      lane-dense row tile
    # w1f_ref:   (W*Cin, W*Cmid)  block-diagonal 1x1-conv weight
    # smid_ref:  (W*Cmid, L)      fold-sum matrix (adds the W replicas per channel)
    # stats_ref: (1, 2, L)        per-tile partial [sum; sumsq] (lane-padded)
    y = jnp.dot(x_ref[...], w1f_ref[...], preferred_element_type=jnp.float32)
    col_sum = jnp.sum(y, axis=0, keepdims=True)                   # (1, W*Cmid)
    col_sq = jnp.sum(y * y, axis=0, keepdims=True)
    s = jnp.dot(col_sum, smid_ref[...], preferred_element_type=jnp.float32)
    q = jnp.dot(col_sq, smid_ref[...], preferred_element_type=jnp.float32)
    stats_ref[0] = jnp.concatenate([s, q], axis=0)                # (2, L)


# ---------------------------------------------------------------------------
# Pass 2: fused conv1 + BN(mid) + LeakyReLU + conv3 + residual + LeakyReLU.
# One image per grid step; also emits per-image partial BN(out) statistics.
# ---------------------------------------------------------------------------
def _residual_main_kernel(x_ref, w1f_ref, band_ref, sc_ref, sh_ref, sout_ref,
                          t_ref, stats_ref):
    # x_ref:     (1, H, W*Cin)
    # w1f_ref:   (W*Cin, W*Cmid)
    # band_ref:  (3, W*Cmid, W*Cout)  banded 3x3-conv weight, one per vertical tap
    # sc_ref/sh_ref: (1, W*Cmid)      folded BN(mid) scale / shift
    # sout_ref:  (W*Cout, L)          fold-sum matrix for BN(out) stats
    # t_ref:     (1, H, W*Cout)       pre-BN(out) activations
    # stats_ref: (1, 2, L)            per-image partial [sum; sumsq] of t
    x_img = x_ref[0]                                              # (H, W*Cin)

    # 1x1 conv + BN(mid) affine + LeakyReLU: one lane-dense MXU matmul + VPU epilogue.
    y = jnp.dot(x_img, w1f_ref[...], preferred_element_type=jnp.float32)
    y = _leaky(y * sc_ref[...] + sh_ref[...])                     # (H, W*Cmid)

    # 3x3 conv: vertical taps via zero-padded row shifts; horizontal taps and
    # the channel contraction are fused into one banded matmul per ky (K = W*Cmid).
    h = y.shape[0]
    zero_row = jnp.zeros((1, y.shape[1]), jnp.float32)
    y_up = jnp.concatenate([zero_row, y[:h - 1]], axis=0)         # input row h-1
    y_dn = jnp.concatenate([y[1:], zero_row], axis=0)             # input row h+1
    acc = jnp.dot(y_up, band_ref[0], preferred_element_type=jnp.float32)
    acc = acc + jnp.dot(y, band_ref[1], preferred_element_type=jnp.float32)
    acc = acc + jnp.dot(y_dn, band_ref[2], preferred_element_type=jnp.float32)

    # Residual add + LeakyReLU (Cin == Cout, so the folded layouts coincide).
    t = _leaky(x_img + acc)                                       # (H, W*Cout)
    t_ref[0] = t

    # Single-pass BN(out) statistics: per-channel sum and sum-of-squares.
    t_sum = jnp.sum(t, axis=0, keepdims=True)                     # (1, W*Cout)
    t_sq = jnp.sum(t * t, axis=0, keepdims=True)
    s = jnp.dot(t_sum, sout_ref[...], preferred_element_type=jnp.float32)
    q = jnp.dot(t_sq, sout_ref[...], preferred_element_type=jnp.float32)
    stats_ref[0] = jnp.concatenate([s, q], axis=0)


# ---------------------------------------------------------------------------
# Pass 3: z = t * scale_out + shift_out   (BN(out) normalisation), lane-dense.
# ---------------------------------------------------------------------------
def _affine_kernel(t_ref, sc_ref, sh_ref, o_ref):
    o_ref[...] = t_ref[...] * sc_ref[...] + sh_ref[...]


# ---------------------------------------------------------------------------
# Host-side folded-weight construction (tiny, built once per call).
# ---------------------------------------------------------------------------
def _fold_sum_matrix(c, width, lanes):
    """(width*c, lanes) matrix S with S[w*c + i, i] = 1: sums the W replicas."""
    s = jnp.tile(jnp.eye(c, dtype=jnp.float32), (width, 1))       # (W*c, c)
    return jnp.pad(s, ((0, 0), (0, lanes - c)))


def _banded_conv3x3(w2, width):
    """Banded matrices B[ky] of shape (W*Cmid, W*Cout).

    B[ky][(w+kx-1)*Cmid + ci, w*Cout + co] = w2[ky, kx, ci, co]; out-of-range
    horizontal taps are simply absent, which implements the zero padding in W."""
    mats = []
    for ky in range(3):
        m = sum(jnp.kron(jnp.eye(width, k=-(kx - 1), dtype=w2.dtype), w2[ky, kx])
                for kx in range(3))
        mats.append(m)
    return jnp.stack(mats)                                        # (3, W*Cmid, W*Cout)


def residual_forward(x_nchw, w1, w2, gamma_mid, beta_mid, gamma_out, beta_out):
    """x_nchw: (N, Cin, H, W) f32 -> (N, Cout, H, W) f32.

    w1: (Cin, Cmid) 1x1-conv weight; w2: (3, 3, Cmid, Cout) 3x3-conv weight."""
    n, cin, h, w = x_nchw.shape
    cmid = w1.shape[1]
    cout = w2.shape[3]
    assert cin == cout, "residual add requires in_channels == out_channels"
    wcin, wcmid, wcout = w * cin, w * cmid, w * cout
    p = n * h * w
    lanes = ((max(cmid, cout) + 127) // 128) * 128                # stats lane padding

    # TODO(synk): fold the NCHW<->NHWC transposes into the producer/consumer if
    #             the surrounding model can stay channels-last.
    x_f = jnp.transpose(x_nchw, (0, 2, 3, 1)).reshape(n, h, wcin)  # W-folded, lane-dense
    x_rows = x_f.reshape(n * h, wcin)

    w1f = jnp.kron(jnp.eye(w, dtype=w1.dtype), w1)                # (W*Cin, W*Cmid)
    band = _banded_conv3x3(w2, w)                                 # (3, W*Cmid, W*Cout)
    s_mid = _fold_sum_matrix(cmid, w, lanes)
    s_out = _fold_sum_matrix(cout, w, lanes)

    cparams = pltpu.CompilerParams(dimension_semantics=("parallel",),
                                   vmem_limit_bytes=VMEM_LIMIT)

    # ---- pass 1: BN(mid) statistics (single pass: sum & sum-of-squares) ----
    nh = n * h
    tr1 = _pick_rows(nh, 512)
    g1 = nh // tr1
    stats_mid = pl.pallas_call(
        _stats_mid_kernel,
        out_shape=jax.ShapeDtypeStruct((g1, 2, lanes), jnp.float32),
        grid=(g1,),
        in_specs=[pl.BlockSpec((tr1, wcin), lambda i: (i, 0)),
                  pl.BlockSpec((wcin, wcmid), lambda i: (0, 0)),
                  pl.BlockSpec((wcmid, lanes), lambda i: (0, 0))],
        out_specs=pl.BlockSpec((1, 2, lanes), lambda i: (i, 0, 0)),
        compiler_params=cparams,
    )(x_rows, w1f, s_mid)

    sum_m = jnp.sum(stats_mid[:, 0, :cmid], axis=0)
    sq_m = jnp.sum(stats_mid[:, 1, :cmid], axis=0)
    mean_m = sum_m / p
    var_m = jnp.maximum(sq_m / p - mean_m * mean_m, 0.0)          # biased (training) var
    scale_m = gamma_mid * lax.rsqrt(var_m + EPS)
    shift_m = beta_mid - mean_m * scale_m
    scale_mf = jnp.tile(scale_m, w)[None, :]                      # (1, W*Cmid)
    shift_mf = jnp.tile(shift_m, w)[None, :]

    # ---- pass 2: fused main kernel, one image per grid step ----------------
    t, stats_out = pl.pallas_call(
        _residual_main_kernel,
        out_shape=(jax.ShapeDtypeStruct((n, h, wcout), jnp.float32),
                   jax.ShapeDtypeStruct((n, 2, lanes), jnp.float32)),
        grid=(n,),
        in_specs=[pl.BlockSpec((1, h, wcin), lambda i: (i, 0, 0)),
                  pl.BlockSpec((wcin, wcmid), lambda i: (0, 0)),
                  pl.BlockSpec((3, wcmid, wcout), lambda i: (0, 0, 0)),
                  pl.BlockSpec((1, wcmid), lambda i: (0, 0)),
                  pl.BlockSpec((1, wcmid), lambda i: (0, 0)),
                  pl.BlockSpec((wcout, lanes), lambda i: (0, 0))],
        out_specs=(pl.BlockSpec((1, h, wcout), lambda i: (i, 0, 0)),
                   pl.BlockSpec((1, 2, lanes), lambda i: (i, 0, 0))),
        compiler_params=cparams,
    )(x_f, w1f, band, scale_mf, shift_mf, s_out)

    sum_o = jnp.sum(stats_out[:, 0, :cout], axis=0)
    sq_o = jnp.sum(stats_out[:, 1, :cout], axis=0)
    mean_o = sum_o / p
    var_o = jnp.maximum(sq_o / p - mean_o * mean_o, 0.0)
    scale_o = gamma_out * lax.rsqrt(var_o + EPS)
    shift_o = beta_out - mean_o * scale_o
    scale_of = jnp.tile(scale_o, w)[None, :]                      # (1, W*Cout)
    shift_of = jnp.tile(shift_o, w)[None, :]

    # ---- pass 3: BN(out) normalisation, tiled lane-dense elementwise --------
    t_rows = t.reshape(nh, wcout)
    tr3 = _pick_rows(nh, 1024)
    g3 = nh // tr3
    z_rows = pl.pallas_call(
        _affine_kernel,
        out_shape=jax.ShapeDtypeStruct((nh, wcout), jnp.float32),
        grid=(g3,),
        in_specs=[pl.BlockSpec((tr3, wcout), lambda i: (i, 0)),
                  pl.BlockSpec((1, wcout), lambda i: (0, 0)),
                  pl.BlockSpec((1, wcout), lambda i: (0, 0))],
        out_specs=pl.BlockSpec((tr3, wcout), lambda i: (i, 0)),
        compiler_params=cparams,
    )(t_rows, scale_of, shift_of)

    z = z_rows.reshape(n, h, w, cout)
    return jnp.transpose(z, (0, 3, 1, 2))                         # NHWC -> NCHW


def residual_reference(x, w1, w2, gm, bm, go, bo):
    """Pure-JAX NCHW reference for the correctness check."""
    w1_oihw = jnp.transpose(w1)[:, :, None, None]                 # (Cmid, Cin, 1, 1)
    w2_oihw = jnp.transpose(w2, (3, 2, 0, 1))                     # (Cout, Cmid, 3, 3)

    def bn(t, g, b):
        m = t.mean(axis=(0, 2, 3), keepdims=True)
        v = ((t - m) ** 2).mean(axis=(0, 2, 3), keepdims=True)
        return (t - m) / jnp.sqrt(v + EPS) * g[None, :, None, None] + b[None, :, None, None]

    def leaky(t):
        return jnp.where(t > 0, t, NEG_SLOPE * t)

    y = lax.conv_general_dilated(x, w1_oihw, (1, 1), 'VALID',
                                 dimension_numbers=('NCHW', 'OIHW', 'NCHW'))
    y = leaky(bn(y, gm, bm))
    y = lax.conv_general_dilated(y, w2_oihw, (1, 1), ((1, 1), (1, 1)),
                                 dimension_numbers=('NCHW', 'OIHW', 'NCHW'))
    z = leaky(x + y)
    return bn(z, go, bo)


if __name__ == "__main__":
    key = jax.random.PRNGKey(0)
    N, Cin, Cmid, Cout, H, W = 2, 8, 4, 8, 16, 16   # residual requires Cin == Cout
    k = jax.random.split(key, 5)

    x = jax.random.normal(k[0], (N, Cin, H, W), jnp.float32)
    # Conv2d(Cin, Cmid, 1) weight (Cmid, Cin, 1, 1) -> stored as (Cin, Cmid)
    w1 = 0.3 * jax.random.normal(k[1], (Cin, Cmid), jnp.float32)
    # Conv2d(Cmid, Cout, 3) weight (Cout, Cmid, 3, 3) -> stored as (3, 3, Cmid, Cout)
    w2 = 0.1 * jax.random.normal(k[2], (3, 3, Cmid, Cout), jnp.float32)
    gamma_mid = 1.0 + 0.1 * jax.random.normal(k[3], (Cmid,), jnp.float32)
    beta_mid = 0.1 * jax.random.normal(k[4], (Cmid,), jnp.float32)
    gamma_out = jnp.ones((Cout,), jnp.float32)      # PyTorch BatchNorm default init
    beta_out = jnp.zeros((Cout,), jnp.float32)

    out = residual_forward(x, w1, w2, gamma_mid, beta_mid, gamma_out, beta_out)
    out = jax.block_until_ready(out)
    assert out.shape == (N, Cout, H, W)

    ref = residual_reference(x, w1, w2, gamma_mid, beta_mid, gamma_out, beta_out)
    assert float(jnp.max(jnp.abs(out - ref))) < 3e-2

    print("KERNEL_OK")
</pallas_src>

<mosaic_0001>
module attributes {stable_mosaic.version = 11 : i64} {
  func.func @_stats_mid_kernel(%arg0: i32, %arg1: memref<32x128xf32, #tpu.memory_space<vmem>>, %arg2: memref<128x64xf32, #tpu.memory_space<vmem>>, %arg3: memref<64x128xf32, #tpu.memory_space<vmem>>, %arg4: memref<1x2x128xf32, #tpu.memory_space<vmem>>) attributes {dimension_semantics = [#tpu.dimension_semantics<parallel>], iteration_bounds = array<i64: 1>, scalar_prefetch = 0 : i64, scratch_operands = 0 : i64, tpu.core_type = #tpu.core_type<tc>, window_params = [{transform_indices = @transform_0, window_bounds = array<i64: 32, 128>}, {pipeline_mode = #tpu.pipeline_mode<synchronous>, transform_indices = @transform_1, window_bounds = array<i64: 128, 64>}, {pipeline_mode = #tpu.pipeline_mode<synchronous>, transform_indices = @transform_2, window_bounds = array<i64: 64, 128>}, {transform_indices = @transform_3, window_bounds = array<i64: 1, 2, 128>}]} {
    %c0 = arith.constant 0 : index
    %c0_0 = arith.constant 0 : index
    %0 = vector.load %arg1[%c0, %c0_0] : memref<32x128xf32, #tpu.memory_space<vmem>>, vector<32x128xf32>
    %c0_1 = arith.constant 0 : index
    %c0_2 = arith.constant 0 : index
    %1 = vector.load %arg2[%c0_1, %c0_2] : memref<128x64xf32, #tpu.memory_space<vmem>>, vector<128x64xf32>
    %cst = arith.constant dense<0.000000e+00> : vector<32x64xf32>
    %2 = tpu.matmul %0, %1, %cst {dimension_numbers = #tpu.dot_dimension_numbers<[1], [0], [0], [1], [0, 0, 1, 1], [], []>} : vector<32x128xf32>, vector<128x64xf32>, vector<32x64xf32> -> vector<32x64xf32>
    %cst_3 = arith.constant dense<0.000000e+00> : vector<64xf32>
    %3 = vector.multi_reduction <add>, %2, %cst_3 [0] : vector<32x64xf32> to vector<64xf32>
    %4 = vector.shape_cast %3 : vector<64xf32> to vector<1x64xf32>
    %5 = arith.mulf %2, %2 : vector<32x64xf32>
    %cst_4 = arith.constant dense<0.000000e+00> : vector<64xf32>
    %6 = vector.multi_reduction <add>, %5, %cst_4 [0] : vector<32x64xf32> to vector<64xf32>
    %7 = vector.shape_cast %6 : vector<64xf32> to vector<1x64xf32>
    %c0_5 = arith.constant 0 : index
    %c0_6 = arith.constant 0 : index
    %8 = vector.load %arg3[%c0_5, %c0_6] : memref<64x128xf32, #tpu.memory_space<vmem>>, vector<64x128xf32>
    %cst_7 = arith.constant dense<0.000000e+00> : vector<1x128xf32>
    %9 = tpu.matmul %4, %8, %cst_7 {dimension_numbers = #tpu.dot_dimension_numbers<[1], [0], [0], [1], [0, 0, 1, 1], [], []>} : vector<1x64xf32>, vector<64x128xf32>, vector<1x128xf32> -> vector<1x128xf32>
    %c0_8 = arith.constant 0 : index
    %c0_9 = arith.constant 0 : index
    %10 = vector.load %arg3[%c0_8, %c0_9] : memref<64x128xf32, #tpu.memory_space<vmem>>, vector<64x128xf32>
    %cst_10 = arith.constant dense<0.000000e+00> : vector<1x128xf32>
    %11 = tpu.matmul %7, %10, %cst_10 {dimension_numbers = #tpu.dot_dimension_numbers<[1], [0], [0], [1], [0, 0, 1, 1], [], []>} : vector<1x64xf32>, vector<64x128xf32>, vector<1x128xf32> -> vector<1x128xf32>
    %12 = tpu.concatenate %9, %11 in 0 : vector<1x128xf32>, vector<1x128xf32> -> vector<2x128xf32>
    %c0_11 = arith.constant 0 : index
    %c0_12 = arith.constant 0 : index
    %c0_13 = arith.constant 0 : index
    %13 = vector.load %arg4[%c0_11, %c0_12, %c0_13] : memref<1x2x128xf32, #tpu.memory_space<vmem>>, vector<1x2x128xf32>
    %14 = vector.shape_cast %13 : vector<1x2x128xf32> to vector<2x128xf32>
    %15 = vector.shape_cast %12 : vector<2x128xf32> to vector<1x2x128xf32>
    tpu.vector_store %arg4[%c0_11, %c0_12, %c0_13], %15 {strides = array<i32>} : memref<1x2x128xf32, #tpu.memory_space<vmem>>, vector<1x2x128xf32>,
    return
  }
  func.func @transform_0(%arg0: i32) -> (i32, i32) {
    %c0_i32 = arith.constant 0 : i32
    %c0_i32_0 = arith.constant 0 : i32
    return %arg0, %c0_i32 : i32, i32
  }
  func.func @transform_1(%arg0: i32) -> (i32, i32) {
    %c0_i32 = arith.constant 0 : i32
    %c0_i32_0 = arith.constant 0 : i32
    %c0_i32_1 = arith.constant 0 : i32
    return %c0_i32, %c0_i32_0 : i32, i32
  }
  func.func @transform_2(%arg0: i32) -> (i32, i32) {
    %c0_i32 = arith.constant 0 : i32
    %c0_i32_0 = arith.constant 0 : i32
    %c0_i32_1 = arith.constant 0 : i32
    return %c0_i32, %c0_i32_0 : i32, i32
  }
  func.func @transform_3(%arg0: i32) -> (i32, i32, i32) {
    %c0_i32 = arith.constant 0 : i32
    %c0_i32_0 = arith.constant 0 : i32
    %c0_i32_1 = arith.constant 0 : i32
    return %arg0, %c0_i32, %c0_i32_0 : i32, i32, i32
  }
}

</mosaic_0001>

<bundles_post_ra>
// kernel: tpu_custom_call.1
= control target key start
LH: loop header
LB: loop body
LE: loop exit
PB: predicated region body
PF: predicated region fallthrough
CT: control target
= control target key end

     0   :  { %s606_s0 = inlined_call_operand.vmem [shape: f32[32,128], index: 0, kind: input, shape index: {}]   ;;  %s607_s1 = inlined_call_operand.vmem [shape: f32[128,64], index: 1, kind: input, shape index: {}]   ;;  %s608_s2 = inlined_call_operand.vmem [shape: f32[64,128], index: 2, kind: input, shape index: {}]   ;;  %s609_s3 = inlined_call_operand.hbm [shape: f32[1,2,128], index: 3, kind: output, shape index: {}]  }
   0x1   :  { %v34_v0 = vld [vmem:[%s607_s1 + $0x78] sm:$0xff]  ;;  %v33_v1 = vld [vmem:[%s607_s1 + $0x70] sm:$0xff]  ;;  %v32_v2 = vld [vmem:[%s607_s1 + $0x68] sm:$0xff] }
   0x2   :  { %365 = vmatprep.subr.mxu0 %v34_v0  ;;  %v31_v3 = vld [vmem:[%s607_s1 + $0x60] sm:$0xff]  ;;  %v30_v5 = vld [vmem:[%s607_s1 + $0x58] sm:$0xff] }
   0x3   :  { %366 = vmatpush3.msra.mxu0 %v34_v0  ;;  %v15_v4 = vld [vmem:[%s606_s0] sm:$0xff] }
   0x4   :  { %367 = vmatprep.subr.mxu0 %v33_v1  ;;  %397 = vmatprep.mubr.f32.mxu0 %v15_v4 }
   0x5   :  { %368 = vmatpush3.msra.mxu0 %v33_v1 }
   0x6   :  { %369 = vmatprep.subr.mxu0 %v32_v2 }
   0x7   :  { %370 = vmatpush3.msra.mxu0 %v32_v2 }
   0x8   :  { %8 = vsyncpa [#allocation3], 0  ;;  %371 = vmatprep.subr.mxu0 %v31_v3  ;;  %v29_v6 = vld [vmem:[%s607_s1 + $0x50] sm:$0xff]  ;;  %v28_v7 = vld [vmem:[%s607_s1 + $0x48] sm:$0xff]  ;;  %v466_v20 = vmov 0.0   ;;  %vm467_vm0 = vmmov 0  }
   0x9   :  { %372 = vmatpush3.msra.mxu0 %v31_v3  ;;  %v27_v8 = vld [vmem:[%s607_s1 + $0x40] sm:$0xff]  ;;  %v26_v9 = vld [vmem:[%s607_s1 + $0x38] sm:$0xff]  ;;  %v25_v10 = vld [vmem:[%s607_s1 + $0x30] sm:$0xff]  ;;  %403 = vmatprep.subr.mxu1 %v466_v20  ;;  %vm120_vm1 = vcmask 523264   ;;  %vm308_vm2 = vcmask 1040384  }
   0xa   :  { %373 = vmatprep.subr.mxu0 %v30_v5  ;;  %v24_v11 = vld [vmem:[%s607_s1 + $0x28] sm:$0xff]  ;;  %v23_v12 = vld [vmem:[%s607_s1 + $0x20] sm:$0xff]  ;;  %v22_v13 = vld [vmem:[%s607_s1 + $0x18] sm:$0xff]  ;;  %419 = vmatprep.mubr.msk.f32.mxu1 %vm467_vm0, %v466_v20 }
   0xb   :  { %374 = vmatpush3.msra.mxu0 %v30_v5  ;;  %v21_v14 = vld [vmem:[%s607_s1 + $0x10] sm:$0xff]  ;;  %v20_v15 = vld [vmem:[%s607_s1 + $0x8] sm:$0xff]  ;;  %v19_v16 = vld [vmem:[%s607_s1] sm:$0xff] }
   0xc   :  { %375 = vmatprep.subr.mxu0 %v29_v6  ;;  %v16_v17 = vld [vmem:[%s606_s0 + $0x8] sm:$0xff]  ;;  %v17_v18 = vld [vmem:[%s606_s0 + $0x10] sm:$0xff]  ;;  %v18_v19 = vld [vmem:[%s606_s0 + $0x18] sm:$0xff] }
   0xd   :  { %376 = vmatpush3.msra.mxu0 %v29_v6  ;;  %v158_v21 = vld [vmem:[%s608_s2 + $0x38] sm:$0xff]  ;;  %v157_v22 = vld [vmem:[%s608_s2 + $0x30] sm:$0xff]  ;;  %v156_v23 = vld [vmem:[%s608_s2 + $0x28] sm:$0xff] }
   0xe   :  { %377 = vmatprep.subr.mxu0 %v28_v7  ;;  %404 = vmatpush3.msra.mxu1 %v158_v21  ;;  %v155_v24 = vld [vmem:[%s608_s2 + $0x20] sm:$0xff]  ;;  %v154_v25 = vld [vmem:[%s608_s2 + $0x18] sm:$0xff]  ;;  %v153_v26 = vld [vmem:[%s608_s2 + $0x10] sm:$0xff] }
   0xf   :  { %378 = vmatpush3.msra.mxu0 %v28_v7  ;;  %405 = vmatprep.subr.mxu1 %v466_v20  ;;  %v152_v27 = vld [vmem:[%s608_s2 + $0x8] sm:$0xff]  ;;  %v151_v28 = vld [vmem:[%s608_s2] sm:$0xff]  ;;  %s468_s2 = smov [#allocation2]  }
  0x10   :  { %379 = vmatprep.subr.mxu0 %v27_v8  ;;  %406 = vmatpush3.msra.mxu1 %v157_v22  ;;  %s317_s12 = sshll.u32 %s468_s2, 4  ;;  %s318_s12 = int_to_ptr.vmem [resolvable:$true] %s317_s12 }
  0x11   :  { %380 = vmatpush3.msra.mxu0 %v27_v8  ;;  %407 = vmatprep.subr.mxu1 %v466_v20  ;;  %s444_s13 = scalar_lea.vmem %s318_s12, 32  ;;  %p449_p1 = scmp.lt.s32.totalorder %s318_s12, %s318_s12 }
  0x12   :  { %381 = vmatprep.subr.mxu0 %v26_v9  ;;  %408 = vmatpush3.msra.mxu1 %v156_v23  ;;  %p445_p0 = scmp.ne.s32.totalorder %s318_s12, %s444_s13  ;;  %p450_p2 = scmp.lt.s32.totalorder %s444_s13, %s444_s13 }
  0x13   :  { %382 = vmatpush3.msra.mxu0 %v26_v9  ;;  %409 = vmatprep.subr.mxu1 %v466_v20 }
  0x14   :  { %383 = vmatprep.subr.mxu0 %v25_v10  ;;  %410 = vmatpush3.msra.mxu1 %v155_v24  ;;  %p451_p3 = por %p450_p2, %p449_p1 }
  0x15   :  { %384 = vmatpush3.msra.mxu0 %v25_v10  ;;  %411 = vmatprep.subr.mxu1 %v466_v20 }
  0x16   :  { %385 = vmatprep.subr.mxu0 %v24_v11  ;;  %412 = vmatpush3.msra.mxu1 %v154_v25  ;;  %p452_p4 = pnand %p451_p3, %p445_p0 }
  0x17   :  { %386 = vmatpush3.msra.mxu0 %v24_v11  ;;  %413 = vmatprep.subr.mxu1 %v466_v20 }
  0x18   :  { %387 = vmatprep.subr.mxu0 %v23_v12  ;;  %414 = vmatpush3.msra.mxu1 %v153_v26 }
  0x19   :  { %388 = vmatpush3.msra.mxu0 %v23_v12  ;;  %415 = vmatprep.subr.mxu1 %v466_v20 }
  0x1a   :  { %389 = vmatprep.subr.mxu0 %v22_v13  ;;  %416 = vmatpush3.msra.mxu1 %v152_v27 }
  0x1b   :  { %390 = vmatpush3.msra.mxu0 %v22_v13  ;;  %417 = vmatprep.subr.mxu1 %v466_v20 }
  0x1c   :  { %391 = vmatprep.subr.mxu0 %v21_v14  ;;  %418 = vmatpush3.msra.mxu1 %v151_v28 }
  0x1d   :  { %392 = vmatpush3.msra.mxu0 %v21_v14  ;;  %422 = vmatprep.subr.mxu1 %v466_v20 }
  0x1e   :  { %393 = vmatprep.subr.mxu0 %v20_v15 }
  0x1f   :  { %394 = vmatpush3.msra.mxu0 %v20_v15 }
  0x20   :  { %395 = vmatprep.subr.mxu0 %v19_v16 }
  0x21   :  { %396 = vmatpush3.msra.mxu0 %v19_v16 }
  0x22   :  { %398 = vmatmul.mubr.f32.vlgmr.msra.gmra.mxu0 %v16_v17 }
  0x23   :  { %400 = vmatprep.mubr.f32.mxu0 %v17_v18 }
  0x26   :  { %401 = vmatmul.mubr.f32.gmra.mxu0 %v18_v19 }
  0xe2   :  { %v399_v29 = vpop.f32.mrf.mxu0 }
  0xe3   :  { %v135_v31 = vmul.f32 %v399_v29, %v399_v29  ;;  %v122_v35 = vsel %vm120_vm1, %v399_v29, 0.0 }
  0xe4   :  { %v101_v30 = vpop.f32.mrf.mxu0 }
  0xe5   :  { %v121_v32 = vsel %vm120_vm1, %v101_v30, 0.0  ;;  %v134_v33 = vmul.f32 %v101_v30, %v101_v30  ;;  %v139_v39 = vsel %vm120_vm1, %v135_v31, 0.0 }
  0xe6   :  { %v402_v34 = vpop.f32.mrf.mxu0  ;;  %v123_v37 = vadd.f32 %v122_v35, %v121_v32 }
  0xe7   :  { %v138_v36 = vsel %vm120_vm1, %v134_v33, 0.0  ;;  %v126_v44 = vsel %vm120_vm1, %v402_v34, 0.0  ;;  %v137_v45 = vmul.f32 %v402_v34, %v402_v34 }
  0xe8   :  { %v111_v38 = vpop.f32.mrf.mxu0  ;;  %v140_v42 = vadd.f32 %v139_v39, %v138_v36 }
  0xe9   :  { %v124_v40 = vsel %vm120_vm1, %v111_v38, 0.0  ;;  %v136_v41 = vmul.f32 %v111_v38, %v111_v38  ;;  %v143_v50 = vsel %vm120_vm1, %v137_v45, 0.0 }
  0xea   :  { %v125_v43 = vadd.f32 %v124_v40, %v123_v37 }
  0xeb   :  { %v141_v46 = vsel %vm120_vm1, %v136_v41, 0.0 }
  0xec   :  { %v127_v47 = vadd.f32 %v126_v44, %v125_v43  ;;  %v142_v48 = vadd.f32 %v141_v46, %v140_v42 }
  0xee   :  { %v128_v49 = vrot.slane %v127_v47, 4  ;;  %v144_v52 = vadd.f32 %v143_v50, %v142_v48 }
  0xf0   :  { %v129_v51 = vadd.f32 %v128_v49, %v127_v47  ;;  %v145_v55 = vrot.slane %v144_v52, 4 }
  0xf2   :  { %v130_v53 = vrot.slane %v129_v51, 2  ;;  %v146_v57 = vadd.f32 %v145_v55, %v144_v52 }
  0xf4   :  { %v131_v54 = vadd.f32 %v130_v53, %v129_v51  ;;  %v147_v59 = vrot.slane %v146_v57, 2 }
  0xf6   :  { %v132_v56 = vrot.slane %v131_v54, 1  ;;  %v148_v60 = vadd.f32 %v147_v59, %v146_v57 }
  0xf8   :  { %v133_v58 = vadd.f32 %v132_v56, %v131_v54  ;;  %v149_v61 = vrot.slane %v148_v60, 1 }
  0xfa   :  { %420 = vmatmul.mubr.msk.f32.vlgmr.msra.gmra.mxu1 %vm120_vm1, %v133_v58  ;;  %v150_v62 = vadd.f32 %v149_v61, %v148_v60 }
  0xfb   :  { %423 = vmatpush3.msra.mxu1 %v158_v21  ;;  %438 = vmatprep.mubr.msk.f32.mxu1 %vm467_vm0, %v466_v20 }
  0xfc   :  { %424 = vmatprep.subr.mxu1 %v466_v20 }
  0xfd   :  { %425 = vmatpush3.msra.mxu1 %v157_v22 }
  0xfe   :  { %426 = vmatprep.subr.mxu1 %v466_v20 }
  0xff   :  { %427 = vmatpush3.msra.mxu1 %v156_v23 }
 0x100   :  { %428 = vmatprep.subr.mxu1 %v466_v20 }
 0x101   :  { %429 = vmatpush3.msra.mxu1 %v155_v24 }
 0x102   :  { %430 = vmatprep.subr.mxu1 %v466_v20 }
 0x103   :  { %431 = vmatpush3.msra.mxu1 %v154_v25 }
 0x104   :  { %432 = vmatprep.subr.mxu1 %v466_v20 }
 0x105   :  { %433 = vmatpush3.msra.mxu1 %v153_v26 }
 0x106   :  { %434 = vmatprep.subr.mxu1 %v466_v20 }
 0x107   :  { %435 = vmatpush3.msra.mxu1 %v152_v27 }
 0x108   :  { %436 = vmatprep.subr.mxu1 %v466_v20 }
 0x109   :  { %437 = vmatpush3.msra.mxu1 %v151_v28 }
 0x10a   :  { %439 = vmatmul.mubr.msk.f32.vlgmr.msra.gmra.mxu1 %vm120_vm1, %v150_v62 }
 0x1ba   :  { %v228_v63 = vpop.f32.mrf.mxu1 }
 0x1bc   :  { %v421_v0 = vpop.f32.mrf.mxu1 }
 0x1ca   :  { %v301_v1 = vpop.f32.mrf.mxu1 }
 0x1cb   :  { %v306_v2 = vrot.slane %v301_v1, 7 }
 0x1cc   :  { %v440_v3 = vpop.f32.mrf.mxu1 }
 0x1cd   :  { %v309_v4 = vsel %vm308_vm2, %v228_v63, %v306_v2 }
 0x1ce   :  { %310 = vst [vmem:[#allocation2] sm:$0x3] %v309_v4 }
 0x1cf   :  { %455 = shalt.err (!%p452_p4)
}
 0x1d0   :  { %320 = dma.vmem_to_hbm [thread:$0]  %s318_s12, 32, %s609_s3, [#allocation3]  }
 0x1d1   :  { %464 = dma.done.wait [#allocation3], 32  }
 0x1d2   :  { %465 = vsyncadd [#allocation3], 4294967264 }
 0x1d3   :  { %324 = vsyncpa [#allocation3], 1 }

</bundles_post_ra>
